<compile_context>
chip_gen: v5e
topology: v5e:2x2
jax: 0.10.0
libtpu: 0.0.40
codegen_flags: <defaults>
</compile_context>

<pallas_src>
import functools

import jax
import jax.numpy as jnp
from jax.experimental import pallas as pl
from jax.experimental.pallas import tpu as pltpu


def _consistency_loss_kernel(x_ref, tgt_ref, pt_ref, o_ref, *,
                             gamma, valid_cols, tm, has_pad):
    """One grid step over a (TB, C, TM, 128) logits slab.

    x_ref:   (TB, C, TM, 128) logits (f32/bf16)
    tgt_ref: (TB, 1, TM, 128) int32 target class per column
    pt_ref:  (TB, 1, TM, 128) calibrated probability at the target class
    o_ref:   (1, 1, 1, 128)   f32 lane-dense partial sum for this step
    """
    j = pl.program_id(1)
    C = x_ref.shape[1]

    tgt = tgt_ref[...]                                    # (TB,1,TM,128) int32

    # Per-class dense (TM,128) slabs, upcast once.  (Unrolled loops target
    # small class counts, which is what this loss is used with.)
    xs = [x_ref[:, c:c + 1, :, :].astype(jnp.float32) for c in range(C)]

    # Running max over classes (log_softmax stability): C-1 elementwise maxes.
    m = xs[0]
    for c in range(1, C):
        m = jnp.maximum(m, xs[c])

    # Fused unrolled loop: logsumexp accumulation + gather of the target-class
    # logit via compare/select (no iota, no one-hot materialization).
    se = jnp.exp(xs[0] - m)
    x_t = jnp.where(tgt == 0, xs[0], jnp.float32(0.0))
    for c in range(1, C):
        se = se + jnp.exp(xs[c] - m)
        x_t = jnp.where(tgt == c, xs[c], x_t)

    logpt = (x_t - m) - jnp.log(se)                       # (TB,1,TM,128)

    # weight = (1 - p_t)^gamma.  torch.no_grad() is a gradient-only detail,
    # irrelevant for the forward value.  Clamp at 0 (see header note);
    # integer gamma -> repeated multiplies.
    pt = pt_ref[...].astype(jnp.float32)
    t = jnp.maximum(1.0 - pt, 0.0)
    g = float(gamma)
    if g == int(g) and 0 <= int(g) <= 8:
        gi = int(g)
        if gi == 0:
            w = jnp.ones_like(t)
        else:
            w = t
            for _ in range(gi - 1):
                w = w * t
    else:
        w = t ** jnp.float32(g)

    loss = -(w * logpt)                                   # (TB,1,TM,128)

    def _store(val):
        # Reduce this step's loss to one lane-dense row; the wrapper sums the
        # tiny per-step partials.
        o_ref[...] = jnp.sum(val, axis=(0, 1, 2), keepdims=True)

    if has_pad:
        last = pl.num_programs(1) - 1

        @pl.when(j != last)
        def _():
            _store(loss)

        @pl.when(j == last)
        def _():
            # Only the last spatial block can contain padded lanes (128-pad)
            # or out-of-bounds groups (ragged final block) — mask them here.
            grp = jax.lax.broadcasted_iota(jnp.int32, loss.shape, 2)
            lane = jax.lax.broadcasted_iota(jnp.int32, loss.shape, 3)
            col = (j * tm + grp) * 128 + lane
            _store(jnp.where(col < valid_cols, loss, 0.0))
    else:
        _store(loss)


def consistency_loss(logits, target, calibrated_probability, *,
                     gamma=3.0, size_average=False, block_cols=65536):
    """Forward pass of ConsistencyLoss.

    logits:  [B, C, H, W] (or [N, C]) float logits (f32 or bf16)
    target:  [B*H*W] (or [N]) integer class indices (row order b*HW + s)
    calibrated_probability: [N, C] float probabilities
    """
    x = logits
    if x.ndim > 2:
        B, C = x.shape[0], x.shape[1]
        x = x.reshape(B, C, -1)                       # [B, C, HW] — free reshape
    else:
        x = x.T[None, :, :]                           # [1, C, N]
    B, C, HW = x.shape
    N = B * HW

    tgt_flat = target.reshape(-1).astype(jnp.int32)   # (N,)
    # Gather the calibrated probability at the target class once here: the
    # kernel consumes a lane-dense [B,1,HW] prob_t stream instead of the full
    # [N, C] tensor (no transpose pass, ~33% fewer kernel input bytes).
    p_t = jnp.take_along_axis(calibrated_probability,
                              tgt_flat[:, None], axis=1)[:, 0]            # (N,)
    tgt = tgt_flat.reshape(B, 1, HW)
    p_t = p_t.reshape(B, 1, HW)

    # Pad the spatial axis only to the 128-lane requirement (NOT to the block
    # width); ragged final blocks are masked in-kernel instead of re-padding
    # whole arrays in HBM.
    hw128 = ((HW + 127) // 128) * 128
    if hw128 != HW:
        pad = hw128 - HW
        x = jnp.pad(x, ((0, 0), (0, 0), (0, pad)))
        tgt = jnp.pad(tgt, ((0, 0), (0, 0), (0, pad)))
        p_t = jnp.pad(p_t, ((0, 0), (0, 0), (0, pad)))
    M = hw128 // 128

    # Dense 4-D layout: [B, C, M, 128] (free reshape of contiguous data).
    x = x.reshape(B, C, M, 128)
    tgt = tgt.reshape(B, 1, M, 128)
    p_t = p_t.reshape(B, 1, M, 128)

    # Block selection: ~block_cols columns per grid step.  Small images are
    # additionally blocked over batch rows so steps stay large.
    tm_target = max(8, ((int(block_cols) // 128) // 8) * 8)
    if M <= tm_target:
        TM, nj = M, 1
        max_tb = max(1, tm_target // M)
        TB = 1
        for d in range(min(B, max_tb), 0, -1):
            if B % d == 0:
                TB = d
                break
        nb = B // TB
    else:
        TB, nb = 1, B
        TM = tm_target
        nj = (M + TM - 1) // TM
    has_pad = (hw128 != HW) or (nj * TM != M)

    kernel = functools.partial(_consistency_loss_kernel, gamma=float(gamma),
                               valid_cols=HW, tm=TM, has_pad=has_pad)

    partials = pl.pallas_call(
        kernel,
        out_shape=jax.ShapeDtypeStruct((nb, nj, 1, 128), jnp.float32),
        grid_spec=pltpu.PrefetchScalarGridSpec(
            num_scalar_prefetch=0,
            grid=(nb, nj),
            in_specs=[
                pl.BlockSpec((TB, C, TM, 128), lambda i, j: (i, 0, j, 0)),
                pl.BlockSpec((TB, 1, TM, 128), lambda i, j: (i, 0, j, 0)),
                pl.BlockSpec((TB, 1, TM, 128), lambda i, j: (i, 0, j, 0)),
            ],
            out_specs=pl.BlockSpec((1, 1, 1, 128), lambda i, j: (i, j, 0, 0)),
        ),
        compiler_params=pltpu.CompilerParams(
            # No cross-step state (each step writes its own partial), so both
            # grid axes can be split across TensorCores (helps small-B v7x).
            dimension_semantics=("parallel", "parallel"),
        ),
    )(x, tgt, p_t)

    total = jnp.sum(partials)
    if size_average:
        return total / jnp.float32(N)
    return total


def _reference(logits, target, calibrated_probability, gamma=3.0,
               size_average=False):
    x = logits
    if x.ndim > 2:
        B, C = x.shape[0], x.shape[1]
        x = x.reshape(B, C, -1).transpose(0, 2, 1).reshape(-1, C)
    tgt = target.reshape(-1)
    logpt = jax.nn.log_softmax(x.astype(jnp.float32), axis=-1)
    logpt = jnp.take_along_axis(logpt, tgt[:, None], axis=1)[:, 0]
    prob = jnp.take_along_axis(calibrated_probability.astype(jnp.float32),
                               tgt[:, None], axis=1)[:, 0]
    weight = (1.0 - prob) ** gamma
    loss = -weight * logpt
    return loss.mean() if size_average else loss.sum()


if __name__ == "__main__":
    key = jax.random.PRNGKey(0)
    keys = jax.random.split(key, 12)

    # --- Test 1: H*W multiple of 128 (no padding, batch-blocked single step) -
    B, C, H, W = 2, 4, 16, 16
    N = B * H * W
    logits = jax.random.normal(keys[0], (B, C, H, W), dtype=jnp.float32)
    target = jax.random.randint(keys[1], (N,), 0, C, dtype=jnp.int32)
    calib = jax.nn.softmax(jax.random.normal(keys[2], (N, C),
                                             dtype=jnp.float32), -1)
    out = jax.block_until_ready(
        consistency_loss(logits, target, calib, gamma=3.0, size_average=False))
    ref = _reference(logits, target, calib, gamma=3.0, size_average=False)
    assert jnp.allclose(out, ref, rtol=1e-4, atol=1e-3), (out, ref)

    # --- Test 2: H*W not a multiple of 128 (lane-pad mask path) + mean -------
    B2, C2, H2, W2 = 2, 4, 10, 10
    N2 = B2 * H2 * W2
    logits2 = jax.random.normal(keys[3], (B2, C2, H2, W2), dtype=jnp.float32)
    target2 = jax.random.randint(keys[4], (N2,), 0, C2, dtype=jnp.int32)
    calib2 = jax.nn.softmax(jax.random.normal(keys[5], (N2, C2),
                                              dtype=jnp.float32), -1)
    out2 = jax.block_until_ready(
        consistency_loss(logits2, target2, calib2, gamma=3.0,
                         size_average=True))
    ref2 = _reference(logits2, target2, calib2, gamma=3.0, size_average=True)
    assert jnp.allclose(out2, ref2, rtol=1e-4, atol=1e-3), (out2, ref2)

    # --- Test 3: multi-block spatial grid with a ragged last block -----------
    B3, C3, H3, W3 = 1, 4, 40, 40        # HW = 1600 -> M = 13 groups
    N3 = B3 * H3 * W3
    logits3 = jax.random.normal(keys[6], (B3, C3, H3, W3), dtype=jnp.float32)
    target3 = jax.random.randint(keys[7], (N3,), 0, C3, dtype=jnp.int32)
    calib3 = jax.nn.softmax(jax.random.normal(keys[8], (N3, C3),
                                              dtype=jnp.float32), -1)
    out3 = jax.block_until_ready(
        consistency_loss(logits3, target3, calib3, gamma=3.0,
                         size_average=False, block_cols=1024))
    ref3 = _reference(logits3, target3, calib3, gamma=3.0, size_average=False)
    assert jnp.allclose(out3, ref3, rtol=1e-4, atol=1e-3), (out3, ref3)

    # --- Test 4: 2-D [N, C] input path ---------------------------------------
    N4, C4 = 300, 4
    logits4 = jax.random.normal(keys[9], (N4, C4), dtype=jnp.float32)
    target4 = jax.random.randint(keys[10], (N4,), 0, C4, dtype=jnp.int32)
    calib4 = jax.nn.softmax(jax.random.normal(keys[11], (N4, C4),
                                              dtype=jnp.float32), -1)
    out4 = jax.block_until_ready(
        consistency_loss(logits4, target4, calib4, gamma=3.0,
                         size_average=False))
    ref4 = _reference(logits4, target4, calib4, gamma=3.0, size_average=False)
    assert jnp.allclose(out4, ref4, rtol=1e-4, atol=1e-3), (out4, ref4)

    print("KERNEL_OK")
</pallas_src>

<mosaic_0001>
module attributes {stable_mosaic.version = 11 : i64} {
  func.func @_consistency_loss_kernel(%arg0: i32, %arg1: i32, %arg2: memref<2x4x2x128xf32, #tpu.memory_space<vmem>>, %arg3: memref<2x1x2x128xi32, #tpu.memory_space<vmem>>, %arg4: memref<2x1x2x128xf32, #tpu.memory_space<vmem>>, %arg5: memref<1x1x1x128xf32, #tpu.memory_space<vmem>>) attributes {dimension_semantics = [#tpu.dimension_semantics<parallel>, #tpu.dimension_semantics<parallel>], iteration_bounds = array<i64: 1, 1>, scalar_prefetch = 0 : i64, scratch_operands = 0 : i64, tpu.core_type = #tpu.core_type<tc>, window_params = [{transform_indices = @transform_0, window_bounds = array<i64: 2, 4, 2, 128>}, {transform_indices = @transform_1, window_bounds = array<i64: 2, 1, 2, 128>}, {transform_indices = @transform_2, window_bounds = array<i64: 2, 1, 2, 128>}, {transform_indices = @transform_3, window_bounds = array<i64: 1, 1, 1, 128>}]} {
    %c0 = arith.constant 0 : index
    %c0_0 = arith.constant 0 : index
    %c0_1 = arith.constant 0 : index
    %c0_2 = arith.constant 0 : index
    %0 = vector.load %arg3[%c0, %c0_0, %c0_1, %c0_2] : memref<2x1x2x128xi32, #tpu.memory_space<vmem>>, vector<2x1x2x128xi32>
    %c0_3 = arith.constant 0 : index
    %c0_4 = arith.constant 0 : index
    %c0_5 = arith.constant 0 : index
    %c0_6 = arith.constant 0 : index
    %1 = vector.load %arg2[%c0_3, %c0_4, %c0_5, %c0_6] : memref<2x4x2x128xf32, #tpu.memory_space<vmem>>, vector<2x1x2x128xf32>
    %c0_7 = arith.constant 0 : index
    %c1 = arith.constant 1 : index
    %c0_8 = arith.constant 0 : index
    %c0_9 = arith.constant 0 : index
    %2 = vector.load %arg2[%c0_7, %c1, %c0_8, %c0_9] : memref<2x4x2x128xf32, #tpu.memory_space<vmem>>, vector<2x1x2x128xf32>
    %c0_10 = arith.constant 0 : index
    %c2 = arith.constant 2 : index
    %c0_11 = arith.constant 0 : index
    %c0_12 = arith.constant 0 : index
    %3 = vector.load %arg2[%c0_10, %c2, %c0_11, %c0_12] : memref<2x4x2x128xf32, #tpu.memory_space<vmem>>, vector<2x1x2x128xf32>
    %c0_13 = arith.constant 0 : index
    %c3 = arith.constant 3 : index
    %c0_14 = arith.constant 0 : index
    %c0_15 = arith.constant 0 : index
    %4 = vector.load %arg2[%c0_13, %c3, %c0_14, %c0_15] : memref<2x4x2x128xf32, #tpu.memory_space<vmem>>, vector<2x1x2x128xf32>
    %5 = arith.maximumf %1, %2 : vector<2x1x2x128xf32>
    %6 = arith.maximumf %5, %3 : vector<2x1x2x128xf32>
    %7 = arith.maximumf %6, %4 : vector<2x1x2x128xf32>
    %8 = arith.subf %1, %7 : vector<2x1x2x128xf32>
    %9 = math.exp %8 : vector<2x1x2x128xf32>
    %c0_i32 = arith.constant 0 : i32
    %10 = vector.broadcast %c0_i32 : i32 to vector<2x1x2x128xi32>
    %11 = arith.cmpi eq, %0, %10 : vector<2x1x2x128xi32>
    %cst = arith.constant 0.000000e+00 : f32
    %12 = vector.broadcast %cst : f32 to vector<2x1x2x128xf32>
    %13 = arith.select %11, %1, %12 : vector<2x1x2x128xi1>, vector<2x1x2x128xf32>
    %14 = arith.subf %2, %7 : vector<2x1x2x128xf32>
    %15 = math.exp %14 : vector<2x1x2x128xf32>
    %16 = arith.addf %9, %15 : vector<2x1x2x128xf32>
    %c1_i32 = arith.constant 1 : i32
    %17 = vector.broadcast %c1_i32 : i32 to vector<2x1x2x128xi32>
    %18 = arith.cmpi eq, %0, %17 : vector<2x1x2x128xi32>
    %19 = arith.select %18, %2, %13 : vector<2x1x2x128xi1>, vector<2x1x2x128xf32>
    %20 = arith.subf %3, %7 : vector<2x1x2x128xf32>
    %21 = math.exp %20 : vector<2x1x2x128xf32>
    %22 = arith.addf %16, %21 : vector<2x1x2x128xf32>
    %c2_i32 = arith.constant 2 : i32
    %23 = vector.broadcast %c2_i32 : i32 to vector<2x1x2x128xi32>
    %24 = arith.cmpi eq, %0, %23 : vector<2x1x2x128xi32>
    %25 = arith.select %24, %3, %19 : vector<2x1x2x128xi1>, vector<2x1x2x128xf32>
    %26 = arith.subf %4, %7 : vector<2x1x2x128xf32>
    %27 = math.exp %26 : vector<2x1x2x128xf32>
    %28 = arith.addf %22, %27 : vector<2x1x2x128xf32>
    %c3_i32 = arith.constant 3 : i32
    %29 = vector.broadcast %c3_i32 : i32 to vector<2x1x2x128xi32>
    %30 = arith.cmpi eq, %0, %29 : vector<2x1x2x128xi32>
    %31 = arith.select %30, %4, %25 : vector<2x1x2x128xi1>, vector<2x1x2x128xf32>
    %32 = arith.subf %31, %7 : vector<2x1x2x128xf32>
    %33 = math.log %28 : vector<2x1x2x128xf32>
    %34 = arith.subf %32, %33 : vector<2x1x2x128xf32>
    %c0_16 = arith.constant 0 : index
    %c0_17 = arith.constant 0 : index
    %c0_18 = arith.constant 0 : index
    %c0_19 = arith.constant 0 : index
    %35 = vector.load %arg4[%c0_16, %c0_17, %c0_18, %c0_19] : memref<2x1x2x128xf32, #tpu.memory_space<vmem>>, vector<2x1x2x128xf32>
    %cst_20 = arith.constant 1.000000e+00 : f32
    %36 = vector.broadcast %cst_20 : f32 to vector<2x1x2x128xf32>
    %37 = arith.subf %36, %35 : vector<2x1x2x128xf32>
    %cst_21 = arith.constant 0.000000e+00 : f32
    %38 = vector.broadcast %cst_21 : f32 to vector<2x1x2x128xf32>
    %39 = arith.maximumf %37, %38 : vector<2x1x2x128xf32>
    %40 = arith.mulf %39, %39 : vector<2x1x2x128xf32>
    %41 = arith.mulf %40, %39 : vector<2x1x2x128xf32>
    %42 = arith.mulf %41, %34 : vector<2x1x2x128xf32>
    %cst_22 = arith.constant 0.000000e+00 : f32
    %43 = vector.broadcast %cst_22 : f32 to vector<2x1x2x128xf32>
    %44 = arith.subf %43, %42 : vector<2x1x2x128xf32>
    %cst_23 = arith.constant dense<0.000000e+00> : vector<128xf32>
    %45 = vector.multi_reduction <add>, %44, %cst_23 [0, 1, 2] : vector<2x1x2x128xf32> to vector<128xf32>
    %46 = vector.shape_cast %45 : vector<128xf32> to vector<1x1x1x128xf32>
    %c0_24 = arith.constant 0 : index
    %c0_25 = arith.constant 0 : index
    %c0_26 = arith.constant 0 : index
    %c0_27 = arith.constant 0 : index
    %47 = vector.load %arg5[%c0_24, %c0_25, %c0_26, %c0_27] : memref<1x1x1x128xf32, #tpu.memory_space<vmem>>, vector<1x1x1x128xf32>
    tpu.vector_store %arg5[%c0_24, %c0_25, %c0_26, %c0_27], %46 {strides = array<i32>} : memref<1x1x1x128xf32, #tpu.memory_space<vmem>>, vector<1x1x1x128xf32>,
    return
  }
  func.func @transform_0(%arg0: i32, %arg1: i32) -> (i32, i32, i32, i32) {
    %c0_i32 = arith.constant 0 : i32
    %c0_i32_0 = arith.constant 0 : i32
    %c0_i32_1 = arith.constant 0 : i32
    return %arg0, %c0_i32, %arg1, %c0_i32_0 : i32, i32, i32, i32
  }
  func.func @transform_1(%arg0: i32, %arg1: i32) -> (i32, i32, i32, i32) {
    %c0_i32 = arith.constant 0 : i32
    %c0_i32_0 = arith.constant 0 : i32
    %c0_i32_1 = arith.constant 0 : i32
    return %arg0, %c0_i32, %arg1, %c0_i32_0 : i32, i32, i32, i32
  }
  func.func @transform_2(%arg0: i32, %arg1: i32) -> (i32, i32, i32, i32) {
    %c0_i32 = arith.constant 0 : i32
    %c0_i32_0 = arith.constant 0 : i32
    %c0_i32_1 = arith.constant 0 : i32
    return %arg0, %c0_i32, %arg1, %c0_i32_0 : i32, i32, i32, i32
  }
  func.func @transform_3(%arg0: i32, %arg1: i32) -> (i32, i32, i32, i32) {
    %c0_i32 = arith.constant 0 : i32
    %c0_i32_0 = arith.constant 0 : i32
    %c0_i32_1 = arith.constant 0 : i32
    return %arg0, %arg1, %c0_i32, %c0_i32_0 : i32, i32, i32, i32
  }
}

</mosaic_0001>

<bundles_post_ra>
// kernel: tpu_custom_call.1
= control target key start
LH: loop header
LB: loop body
LE: loop exit
PB: predicated region body
PF: predicated region fallthrough
CT: control target
= control target key end

     0   :  { %8 = vsyncpa [#allocation3], 0  ;;  %s378_s0 = inlined_call_operand.hbm [shape: f32[2,4,2,128], index: 0, kind: input, shape index: {}]   ;;  %s379_s1 = inlined_call_operand.hbm [shape: s32[2,1,2,128], index: 1, kind: input, shape index: {}]   ;;  %s380_s2 = inlined_call_operand.hbm [shape: f32[2,1,2,128], index: 2, kind: input, shape index: {}]   ;;  %s381_s3 = inlined_call_operand.hbm [shape: f32[1,1,1,128], index: 3, kind: output, shape index: {}]  }
   0x1   :  { %9 = vsyncpa [#allocation6], 0 }
   0x2   :  { %10 = vsyncpa [#allocation4], 0  ;;  %s28_s14 = sshll.u32 %s379_s1, 4  ;;  %s306_s15 = smov [#allocation5]   ;;  %s29_s14 = int_to_ptr.hbm [resolvable:$true] %s28_s14 }
   0x3   :  { %s30_s16 = sshll.u32 %s306_s15, 4  ;;  %s15_s19 = sshll.u32 %s378_s0, 4  ;;  %s31_s16 = int_to_ptr.vmem [resolvable:$true] %s30_s16  ;;  %s16_s19 = int_to_ptr.hbm [resolvable:$true] %s15_s19 }
   0x4   :  { %s307_s20 = smov 32   ;;  %s308_s21 = smov 2  }
   0x5   :  { %36 = dma.hbm_to_vmem [thread:$0]  %s29_s14, 64, %s31_s16, [#allocation6], %s307_s20, %s307_s20, %s308_s21  }
   0x6   :  { %s309_s22 = smov [#allocation2]   ;;  %s41_s26 = sshll.u32 %s380_s2, 4  ;;  %s42_s26 = int_to_ptr.hbm [resolvable:$true] %s41_s26 }
   0x7   :  { %s17_s23 = sshll.u32 %s309_s22, 4  ;;  %s310_s1 = smov [#allocation7]   ;;  %s18_s23 = int_to_ptr.vmem [resolvable:$true] %s17_s23 }
   0x8   :  { %23 = dma.hbm_to_vmem [thread:$0]  %s16_s19, 256, %s18_s23, [#allocation3], %s307_s20, %s307_s20, %s308_s21  }
   0x9   :  { %s43_s27 = sshll.u32 %s310_s1, 4  ;;  %s44_s27 = int_to_ptr.vmem [resolvable:$true] %s43_s27 }
   0xa   :  { %49 = dma.hbm_to_vmem [thread:$0]  %s42_s26, 64, %s44_s27, [#allocation6], %s307_s20, %s307_s20, %s308_s21  }
   0xb   :  { %300 = dma.done.wait [#allocation3], 256  }
   0xc   :  { %301 = vsyncadd [#allocation3], 4294967040 }
   0xd   :  { %302 = dma.done.wait [#allocation6], 128  }
   0xe   :  { %303 = vsyncadd [#allocation6], 4294967168  ;;  %v64_v0 = vld [vmem:[#allocation2] sm:$0x3]  ;;  %v65_v1 = vld [vmem:[#allocation2 + $0x8] sm:$0x3] }
   0xf   :  { %v67_v2 = vld [vmem:[#allocation2 + $0x2] sm:$0x3]  ;;  %v68_v3 = vld [vmem:[#allocation2 + $0xa] sm:$0x3]  ;;  %v341_v4 = vld [vmem:[#allocation2 + $0x4] sm:$0x3] }
  0x10   :  { %v343_v5 = vld [vmem:[#allocation2 + $0xc] sm:$0x3]  ;;  %v75_v6 = vmax.f32 %v64_v0, %v67_v2  ;;  %v76_v7 = vmax.f32 %v65_v1, %v68_v3  ;;  %v345_v8 = vld [vmem:[#allocation2 + $0x6] sm:$0x3]  ;;  %v347_v9 = vld [vmem:[#allocation2 + $0xe] sm:$0x3] }
  0x11   :  { %v62_v28 = vld [vmem:[#allocation5] sm:$0x3]  ;;  %v63_v30 = vld [vmem:[#allocation5 + $0x2] sm:$0x3]  ;;  %v135_v34 = vld [vmem:[#allocation7] sm:$0x3] }
  0x12   :  { %v77_v10 = vmax.f32 %v75_v6, %v341_v4  ;;  %v78_v11 = vmax.f32 %v76_v7, %v343_v5  ;;  %vm87_vm0 = vcmp.eq.s32.totalorder %v62_v28, 0  ;;  %vm88_vm1 = vcmp.eq.s32.totalorder %v63_v30, 0  ;;  %v136_v37 = vld [vmem:[#allocation7 + $0x2] sm:$0x3]  ;;  %s311_s0 = smov [#allocation8]   ;;  %s167_s30 = sshll.u32 %s381_s3, 4  ;;  %s168_s30 = int_to_ptr.hbm [resolvable:$true] %s167_s30 }
  0x13   :  { %v89_v36 = vsel %vm87_vm0, %v64_v0, 0.0  ;;  %vm99_vm2 = vcmp.eq.s32.totalorder %v62_v28, 1  ;;  %v90_v39 = vsel %vm88_vm1, %v65_v1, 0.0  ;;  %vm100_vm3 = vcmp.eq.s32.totalorder %v63_v30, 1  ;;  %s165_s2 = sshll.u32 %s311_s0, 4  ;;  %s166_s2 = int_to_ptr.vmem [resolvable:$true] %s165_s2 }
  0x14   :  { %v352_v12 = vmax.f32 %v77_v10, %v345_v8  ;;  %v355_v13 = vmax.f32 %v78_v11, %v347_v9  ;;  %v137_v43 = vsub.f32 1.0, %v135_v34  ;;  %v101_v45 = vsel %vm99_vm2, %v67_v2, %v89_v36 }
  0x15   :  { %vm111_vm4 = vcmp.eq.s32.totalorder %v62_v28, 2  ;;  %v138_v47 = vsub.f32 1.0, %v136_v37  ;;  %v102_v49 = vsel %vm100_vm3, %v68_v3, %v90_v39  ;;  %vm112_vm5 = vcmp.eq.s32.totalorder %v63_v30, 2 }
  0x16   :  { %v81_v14 = vsub.f32 %v64_v0, %v352_v12  ;;  %v82_v15 = vsub.f32 %v65_v1, %v355_v13  ;;  %v91_v16 = vsub.f32 %v67_v2, %v352_v12  ;;  %v92_v17 = vsub.f32 %v68_v3, %v355_v13 }
  0x17   :  { %v103_v18 = vsub.f32 %v341_v4, %v352_v12  ;;  %v104_v19 = vsub.f32 %v343_v5, %v355_v13  ;;  %v115_v23 = vsub.f32 %v345_v8, %v352_v12  ;;  %v116_v25 = vsub.f32 %v347_v9, %v355_v13 }
  0x18   :  { %v83_v20 = vmul.f32 1.442695, %v81_v14  ;;  %v85_v21 = vmul.f32 1.442695, %v82_v15  ;;  %v93_v22 = vmul.f32 1.442695, %v91_v16  ;;  %v113_v53 = vsel %vm111_vm4, %v341_v4, %v101_v45 }
  0x19   :  { %v95_v24 = vmul.f32 1.442695, %v92_v17  ;;  %v105_v26 = vmul.f32 1.442695, %v103_v18  ;;  %v107_v27 = vmul.f32 1.442695, %v104_v19  ;;  %v114_v56 = vsel %vm112_vm5, %v343_v5, %v102_v49 }
  0x1a   :  { %184 = vpow2.f32 %v83_v20  ;;  %v117_v29 = vmul.f32 1.442695, %v115_v23  ;;  %v119_v31 = vmul.f32 1.442695, %v116_v25  ;;  %vm123_vm6 = vcmp.eq.s32.totalorder %v62_v28, 3 }
  0x1b   :  { %186 = vpow2.f32 %v85_v21  ;;  %v139_v55 = vmax.f32 %v137_v43, 0.0  ;;  %vm124_vm7 = vcmp.eq.s32.totalorder %v63_v30, 3  ;;  %v140_v57 = vmax.f32 %v138_v47, 0.0 }
  0x1c   :  { %188 = vpow2.f32 %v93_v22  ;;  %v125_v58 = vsel %vm123_vm6, %v345_v8, %v113_v53  ;;  %v126_v59 = vsel %vm124_vm7, %v347_v9, %v114_v56  ;;  %vm149_vm8 = vcmask 1041408  }
  0x1d   :  { %190 = vpow2.f32 %v95_v24  ;;  %v141_v60 = vmul.f32 %v139_v55, %v139_v55  ;;  %v142_v61 = vmul.f32 %v140_v57, %v140_v57  ;;  %v127_v62 = vsub.f32 %v125_v58, %v352_v12 }
  0x1e   :  { %192 = vpow2.f32 %v105_v26  ;;  %v128_v0 = vsub.f32 %v126_v59, %v355_v13 }
  0x1f   :  { %194 = vpow2.f32 %v107_v27  ;;  %v143_v3 = vmul.f32 %v141_v60, %v139_v55  ;;  %v144_v5 = vmul.f32 %v142_v61, %v140_v57 }
  0x20   :  { %v185_v32 = vpop.eup %184  ;;  %196 = vpow2.f32 %v117_v29 }
  0x21   :  { %v187_v33 = vpop.eup %186  ;;  %198 = vpow2.f32 %v119_v31 }
  0x22   :  { %v189_v35 = vpop.eup %188 }
  0x23   :  { %v191_v38 = vpop.eup %190  ;;  %v97_v40 = vadd.f32 %v189_v35, %v185_v32 }
  0x24   :  { %v193_v41 = vpop.eup %192  ;;  %v98_v42 = vadd.f32 %v191_v38, %v187_v33 }
  0x25   :  { %v195_v44 = vpop.eup %194  ;;  %v109_v46 = vadd.f32 %v193_v41, %v97_v40 }
  0x26   :  { %v197_v48 = vpop.eup %196  ;;  %v110_v50 = vadd.f32 %v195_v44, %v98_v42 }
  0x27   :  { %v199_v51 = vpop.eup %198  ;;  %v121_v52 = vadd.f32 %v197_v48, %v109_v46 }
  0x28   :  { %v122_v54 = vadd.f32 %v199_v51, %v110_v50 }
  0x29   :  { %200 = vlog2.f32 %v121_v52 }
  0x2a   :  { %202 = vlog2.f32 %v122_v54 }
  0x2f   :  { %v201_v63 = vpop.eup %200 }
  0x30   :  { %v203_v1 = vpop.eup %202  ;;  %v130_v2 = vmul.f32 0.6931472, %v201_v63 }
  0x31   :  { %v132_v4 = vmul.f32 0.6931472, %v203_v1 }
  0x32   :  { %v133_v6 = vsub.f32 %v127_v62, %v130_v2 }
  0x33   :  { %v134_v7 = vsub.f32 %v128_v0, %v132_v4 }
  0x34   :  { %v145_v10 = vmul.f32 %v143_v3, %v133_v6 }
  0x35   :  { %v146_v11 = vmul.f32 %v144_v5, %v134_v7 }
  0x36   :  { %v147_v8 = vsub.f32 0.0, %v145_v10 }
  0x37   :  { %v148_v14 = vsub.f32 0.0, %v146_v11 }
  0x38   :  { %v150_v9 = vsel %vm149_vm8, %v147_v8, 0.0 }
  0x39   :  { %v151_v15 = vsel %vm149_vm8, %v148_v14, 0.0 }
  0x3a   :  { %v152_v16 = vadd.f32 %v151_v15, %v150_v9 }
  0x3c   :  { %v153_v17 = vrot.slane %v152_v16, 4 }
  0x3e   :  { %v154_v12 = vadd.f32 %v153_v17, %v152_v16 }
  0x40   :  { %v155_v18 = vrot.slane %v154_v12, 2 }
  0x42   :  { %v156_v19 = vadd.f32 %v155_v18, %v154_v12 }
  0x44   :  { %v157_v13 = vrot.slane %v156_v19, 1 }
  0x46   :  { %v158_v20 = vadd.f32 %v157_v13, %v156_v19 }
  0x48   :  { %159 = vst [vmem:[#allocation8] sm:$0x1] %v158_v20 }
  0x49   :  { %170 = dma.vmem_to_hbm [thread:$0]  %s166_s2, 16, %s168_s30, [#allocation4]  }
  0x4a   :  { %304 = dma.done.wait [#allocation4], 16  }
  0x4b   :  { %305 = vsyncadd [#allocation4], 4294967280 }
  0x4c   :  { %175 = vsyncpa [#allocation3], 1 }
  0x4d   :  { %176 = vsyncpa [#allocation6], 1 }
  0x4e   :  { %177 = vsyncpa [#allocation4], 1 }

</bundles_post_ra>
